<compile_context>
chip_gen: v7x
topology: tpu7x:2x2x1
jax: 0.10.0
libtpu: 0.0.40
codegen_flags: <defaults>
</compile_context>

<pallas_src>
import functools

import jax
import jax.numpy as jnp
from jax import lax
from jax.experimental import pallas as pl
from jax.experimental.pallas import tpu as pltpu

_LANE = 128
_NACC = 4                                # independent chunk chains per loop iter
_TARGET_BLOCK_BYTES = 8 * 1024 * 1024    # ~8 MiB input block per pipeline buffer
_VMEM_LIMIT_BYTES = 32 * 1024 * 1024     # explicit; >= scoped default on all gens


def _round_up(v, m):
    return -(-v // m) * m


def _sum_chunks(x_ref, rows, chunk_w, n_full, partial_valid):
    """(rows, chunk_w) f32 partial sum of the first n_full full chunks of the
    current tile plus (optionally) one partial chunk with `partial_valid`
    valid lanes (lanes beyond that hold unspecified data and are zeroed)."""
    f32 = jnp.float32

    def chunk(k):
        return x_ref[:, k * chunk_w:(k + 1) * chunk_w].astype(f32)

    acc = jnp.zeros((rows, chunk_w), f32)
    n_groups = n_full // _NACC
    start = 0

    if n_groups >= 8:
        # Long tiles: rolled loop, 4 independent chunk loads/adds per iter so
        # the loop-carried dependency is a single VPU add per iteration.
        def body(g, a):
            base = g * (_NACC * chunk_w)

            def ld(off):
                return x_ref[:, pl.ds(pl.multiple_of(base + off, chunk_w),
                                      chunk_w)].astype(f32)

            c0, c1, c2, c3 = ld(0), ld(chunk_w), ld(2 * chunk_w), ld(3 * chunk_w)
            return a + ((c0 + c1) + (c2 + c3))

        acc = lax.fori_loop(0, n_groups, body, acc, unroll=4)
        start = n_groups * _NACC

    # Static remainder (+ masked partial chunk) combined as a tree of
    # independent adds rather than one long serial chain.
    parts = [chunk(k) for k in range(start, n_full)]
    if partial_valid:
        lane = lax.broadcasted_iota(jnp.int32, (rows, chunk_w), 1)
        parts.append(jnp.where(lane < partial_valid, chunk(n_full), f32(0.0)))
    while len(parts) > 1:
        nxt = [parts[t] + parts[t + 1] for t in range(0, len(parts) - 1, 2)]
        if len(parts) % 2:
            nxt.append(parts[-1])
        parts = nxt
    if parts:
        acc = acc + parts[0]
    return acc


def _channel_sum_kernel(x_ref, o_ref, acc_ref, *, tile_l, chunk_w, spatial, nj_pp):
    """Per-row (= per batch*channel) sums, accumulated over spatial tiles.

    Grid: (batch_block [parallel], spatial_partition [parallel],
           spatial_tile_within_partition [arbitrary]).
    x_ref:   (rows, tile_l) lane-dense input block (last block may be partial).
    o_ref:   (1, rows, 1) f32 partial sum for this (partition, batch block).
    acc_ref: (rows, chunk_w) f32 lane-dense accumulator scratch.
    """
    p = pl.program_id(1)
    j = pl.program_id(2)
    rows = acc_ref.shape[0]

    @pl.when(j == 0)
    def _init():
        acc_ref[...] = jnp.zeros_like(acc_ref)

    g = p * nj_pp + j                 # global spatial tile index
    n_full_tiles = spatial // tile_l  # tiles with no masking needed (static)
    tail = spatial % tile_l           # valid columns in the one partial tile

    if n_full_tiles > 0:
        @pl.when(g < n_full_tiles)
        def _full_tile():
            acc_ref[...] += _sum_chunks(x_ref, rows, chunk_w, tile_l // chunk_w, 0)

    if tail:
        @pl.when(g == n_full_tiles)
        def _tail_tile():
            acc_ref[...] += _sum_chunks(x_ref, rows, chunk_w,
                                        tail // chunk_w, tail % chunk_w)

    # Phantom tiles (g beyond the data, only when the spatial axis is split
    # across partitions and nj is odd) contribute nothing.

    @pl.when(j == nj_pp - 1)
    def _finalize():
        # Single cross-lane reduce + narrow store, outside the hot loop.
        o_ref[...] = jnp.sum(acc_ref[...], axis=1, keepdims=True)[None]


@functools.partial(jax.jit, static_argnames=("max_tile_l", "max_batch_tile"))
def l_color(x, *, max_tile_l=None, max_batch_tile=None):
    """Color constancy loss: x (b, 3, h, w) -> (b, 1, 1, 1), like torch L_color."""
    b, c, h, w = x.shape
    assert c == 3, "L_color expects 3 (RGB) channels"
    spatial = h * w
    itemsize = jnp.dtype(x.dtype).itemsize

    # Lane-dense layout: (b*3, H*W). Free reshape for contiguous NCHW input.
    xf = x.reshape(b * 3, spatial)

    # ---- batch tiling ------------------------------------------------------
    if max_batch_tile is None:
        # rows = 3*b_tile must be a multiple of 8 (f32) / 16 (packed bf16)
        # whenever the batch is split into multiple blocks.
        max_batch_tile = 16 if itemsize < 4 else 8
    if b > max_batch_tile:
        max_batch_tile = max(8, (max_batch_tile // 8) * 8)
    b_tile = b if b <= max_batch_tile else max_batch_tile
    rows = b_tile * 3
    b_blocks = pl.cdiv(b, b_tile)

    # ---- spatial tiling (sized from the data; no wrapper-side padding) -----
    if max_tile_l is None:
        max_tile_l = max(_LANE,
                         (_TARGET_BLOCK_BYTES // (rows * itemsize)) // _LANE * _LANE)
    if spatial <= _LANE:
        tile_l = spatial          # full-dim block; everything valid
        chunk_w = spatial
    else:
        ntiles = pl.cdiv(spatial, max_tile_l)
        if ntiles == 1 and spatial % _LANE != 0:
            ntiles = 2            # keep every block within the unpadded extent
        tile_l = _round_up(pl.cdiv(spatial, ntiles), _LANE)
        chunk_w = _LANE
    nj = pl.cdiv(spatial, tile_l)

    # ---- split spatial across cores when the batch gives only one block ----
    n_par = 2 if (b_blocks == 1 and nj >= 2) else 1
    nj_pp = pl.cdiv(nj, n_par)

    def in_map(i, p, j):
        g = p * nj_pp + j
        return (i, jnp.minimum(g, nj - 1))   # clamp phantom tiles

    kernel = functools.partial(_channel_sum_kernel, tile_l=tile_l,
                               chunk_w=chunk_w, spatial=spatial, nj_pp=nj_pp)

    cost = pl.CostEstimate(
        flops=b * 3 * spatial,
        transcendentals=0,
        bytes_accessed=b * 3 * spatial * itemsize + n_par * b * 3 * 4)

    part_sums = pl.pallas_call(
        kernel,
        out_shape=jax.ShapeDtypeStruct((n_par, b * 3, 1), jnp.float32),
        grid_spec=pltpu.PrefetchScalarGridSpec(
            num_scalar_prefetch=0,
            grid=(b_blocks, n_par, nj_pp),
            in_specs=[pl.BlockSpec((rows, tile_l), in_map)],
            out_specs=pl.BlockSpec((1, rows, 1), lambda i, p, j: (p, i, 0)),
            scratch_shapes=[pltpu.VMEM((rows, chunk_w), jnp.float32)],
        ),
        compiler_params=pltpu.CompilerParams(
            dimension_semantics=("parallel", "parallel", "arbitrary"),
            vmem_limit_bytes=_VMEM_LIMIT_BYTES),
        cost_estimate=cost,
    )(xf)

    # Tiny epilogue on the (b, 3) channel means in plain JAX (f32 math).
    sums = jnp.sum(part_sums, axis=0)                 # (b*3, 1)
    means = sums.reshape(b, 3) / jnp.float32(spatial)
    mr, mg, mb = means[:, 0], means[:, 1], means[:, 2]
    drg = (mr - mg) ** 2
    drb = (mr - mb) ** 2
    dgb = (mb - mg) ** 2
    k = jnp.sqrt(drg ** 2 + drb ** 2 + dgb ** 2)
    return k.reshape(b, 1, 1, 1).astype(x.dtype)


def _l_color_ref(x):
    # Plain-JAX reference mirroring the PyTorch forward.
    mean_rgb = jnp.mean(x.astype(jnp.float32), axis=(2, 3), keepdims=True)
    mr = mean_rgb[:, 0:1]
    mg = mean_rgb[:, 1:2]
    mb = mean_rgb[:, 2:3]
    drg = (mr - mg) ** 2
    drb = (mr - mb) ** 2
    dgb = (mb - mg) ** 2
    return jnp.sqrt(drg ** 2 + drb ** 2 + dgb ** 2).astype(x.dtype)


if __name__ == "__main__":
    keys = jax.random.split(jax.random.PRNGKey(0), 6)

    # 1: canonical small input — single tile, single batch block.
    x1 = jax.random.uniform(keys[0], (2, 3, 16, 16), dtype=jnp.float32)
    out1 = jax.block_until_ready(l_color(x1))
    assert out1.shape == (2, 1, 1, 1)
    assert jnp.allclose(out1, _l_color_ref(x1), atol=1e-6, rtol=1e-4)

    # 2: ragged spatial size + forced tiling -> in-kernel tail masking,
    #    accumulator reset/finalize, 2-way spatial split (b_blocks == 1) and
    #    a phantom tile (nj = 3 over 2 partitions).
    x2 = jax.random.uniform(keys[1], (3, 3, 20, 37), dtype=jnp.float32)
    out2 = jax.block_until_ready(l_color(x2, max_tile_l=256))
    assert out2.shape == (3, 1, 1, 1)
    assert jnp.allclose(out2, _l_color_ref(x2), atol=1e-6, rtol=1e-4)

    # 3: batch > tile -> multiple blocks on the parallel batch axis;
    #    spatial < 128 exercises the full-dim narrow-block path.
    x3 = jax.random.uniform(keys[2], (16, 3, 8, 8), dtype=jnp.float32)
    out3 = jax.block_until_ready(l_color(x3))
    assert out3.shape == (16, 1, 1, 1)
    assert jnp.allclose(out3, _l_color_ref(x3), atol=1e-6, rtol=1e-4)

    # 4: b not a multiple of the batch tile (partial last batch block).
    x4 = jax.random.uniform(keys[3], (10, 3, 8, 8), dtype=jnp.float32)
    out4 = jax.block_until_ready(l_color(x4, max_batch_tile=8))
    assert out4.shape == (10, 1, 1, 1)
    assert jnp.allclose(out4, _l_color_ref(x4), atol=1e-6, rtol=1e-4)

    # 5: wide single tile -> exercises the rolled fori_loop chunk reduction.
    x5 = jax.random.uniform(keys[4], (1, 3, 64, 250), dtype=jnp.float32)
    out5 = jax.block_until_ready(l_color(x5))
    assert out5.shape == (1, 1, 1, 1)
    assert jnp.allclose(out5, _l_color_ref(x5), atol=1e-6, rtol=1e-4)

    # 6: bf16 input path (f32 accumulation, dtype-aware tiling).
    x6 = jax.random.uniform(keys[5], (2, 3, 24, 24), dtype=jnp.float32
                            ).astype(jnp.bfloat16)
    out6 = jax.block_until_ready(l_color(x6))
    assert out6.shape == (2, 1, 1, 1)
    assert jnp.allclose(out6.astype(jnp.float32),
                        _l_color_ref(x6).astype(jnp.float32),
                        atol=1e-4, rtol=5e-2)

    print("KERNEL_OK")
</pallas_src>

<mosaic_0001>
module attributes {stable_mosaic.version = 11 : i64} {
  func.func @_channel_sum_kernel(%arg0: i32, %arg1: i32, %arg2: i32, %arg3: memref<6x256xf32, #tpu.memory_space<vmem>>, %arg4: memref<1x6x1xf32, #tpu.memory_space<vmem>>, %arg5: memref<6x128xf32, #tpu.memory_space<vmem>>) attributes {dimension_semantics = [#tpu.dimension_semantics<parallel>, #tpu.dimension_semantics<parallel>, #tpu.dimension_semantics<arbitrary>], iteration_bounds = array<i64: 1, 1, 1>, scalar_prefetch = 0 : i64, scratch_operands = 1 : i64, tpu.core_type = #tpu.core_type<tc>, window_params = [{transform_indices = @transform_0, window_bounds = array<i64: 6, 256>}, {transform_indices = @transform_1, window_bounds = array<i64: 1, 6, 1>}]} {
    %c0_i32 = arith.constant 0 : i32
    %0 = arith.cmpi eq, %arg2, %c0_i32 : i32
    %1 = arith.extui %0 : i1 to i32
    %c0_i32_0 = arith.constant 0 : i32
    %2 = arith.cmpi ne, %1, %c0_i32_0 : i32
    scf.if %2 {
      %cst = arith.constant 0.000000e+00 : f32
      %11 = vector.broadcast %cst : f32 to vector<6x128xf32>
      %c0 = arith.constant 0 : index
      %c0_5 = arith.constant 0 : index
      %12 = vector.load %arg5[%c0, %c0_5] : memref<6x128xf32, #tpu.memory_space<vmem>>, vector<6x128xf32>
      tpu.vector_store %arg5[%c0, %c0_5], %11 {strides = array<i32>} : memref<6x128xf32, #tpu.memory_space<vmem>>, vector<6x128xf32>,
    } else {
    }
    %c1_i32 = arith.constant 1 : i32
    %3 = arith.muli %arg1, %c1_i32 : i32
    %4 = arith.addi %3, %arg2 : i32
    %c1_i32_1 = arith.constant 1 : i32
    %5 = arith.cmpi slt, %4, %c1_i32_1 : i32
    %6 = arith.extui %5 : i1 to i32
    %c0_i32_2 = arith.constant 0 : i32
    %7 = arith.cmpi ne, %6, %c0_i32_2 : i32
    scf.if %7 {
      %c0 = arith.constant 0 : index
      %c0_5 = arith.constant 0 : index
      %11 = vector.load %arg5[%c0, %c0_5] : memref<6x128xf32, #tpu.memory_space<vmem>>, vector<6x128xf32>
      %cst = arith.constant 0.000000e+00 : f32
      %12 = vector.broadcast %cst : f32 to vector<6x128xf32>
      %c0_6 = arith.constant 0 : index
      %c0_7 = arith.constant 0 : index
      %13 = vector.load %arg3[%c0_6, %c0_7] : memref<6x256xf32, #tpu.memory_space<vmem>>, vector<6x128xf32>
      %c0_8 = arith.constant 0 : index
      %c128 = arith.constant 128 : index
      %14 = vector.load %arg3[%c0_8, %c128] : memref<6x256xf32, #tpu.memory_space<vmem>>, vector<6x128xf32>
      %15 = arith.addf %13, %14 : vector<6x128xf32>
      %16 = arith.addf %12, %15 : vector<6x128xf32>
      %17 = arith.addf %11, %16 : vector<6x128xf32>
      %c0_9 = arith.constant 0 : index
      %c0_10 = arith.constant 0 : index
      %18 = vector.load %arg5[%c0_9, %c0_10] : memref<6x128xf32, #tpu.memory_space<vmem>>, vector<6x128xf32>
      tpu.vector_store %arg5[%c0_9, %c0_10], %17 {strides = array<i32>} : memref<6x128xf32, #tpu.memory_space<vmem>>, vector<6x128xf32>,
    } else {
    }
    %c0_i32_3 = arith.constant 0 : i32
    %8 = arith.cmpi eq, %arg2, %c0_i32_3 : i32
    %9 = arith.extui %8 : i1 to i32
    %c0_i32_4 = arith.constant 0 : i32
    %10 = arith.cmpi ne, %9, %c0_i32_4 : i32
    scf.if %10 {
      %c0 = arith.constant 0 : index
      %c0_5 = arith.constant 0 : index
      %11 = vector.load %arg5[%c0, %c0_5] : memref<6x128xf32, #tpu.memory_space<vmem>>, vector<6x128xf32>
      %cst = arith.constant dense<0.000000e+00> : vector<6xf32>
      %12 = vector.multi_reduction <add>, %11, %cst [1] : vector<6x128xf32> to vector<6xf32>
      %13 = vector.shape_cast %12 : vector<6xf32> to vector<6x1xf32>
      %14 = vector.shape_cast %13 : vector<6x1xf32> to vector<1x6x1xf32>
      %c0_6 = arith.constant 0 : index
      %c0_7 = arith.constant 0 : index
      %c0_8 = arith.constant 0 : index
      %15 = vector.load %arg4[%c0_6, %c0_7, %c0_8] : memref<1x6x1xf32, #tpu.memory_space<vmem>>, vector<1x6x1xf32>
      tpu.vector_store %arg4[%c0_6, %c0_7, %c0_8], %14 {strides = array<i32>} : memref<1x6x1xf32, #tpu.memory_space<vmem>>, vector<1x6x1xf32>,
    } else {
    }
    return
  }
  func.func @transform_0(%arg0: i32, %arg1: i32, %arg2: i32) -> (i32, i32) {
    %c1_i32 = arith.constant 1 : i32
    %0 = arith.muli %arg1, %c1_i32 : i32
    %1 = arith.addi %0, %arg2 : i32
    %c0_i32 = arith.constant 0 : i32
    %2 = arith.minsi %1, %c0_i32 : i32
    %c0_i32_0 = arith.constant 0 : i32
    return %arg0, %2 : i32, i32
  }
  func.func @transform_1(%arg0: i32, %arg1: i32, %arg2: i32) -> (i32, i32, i32) {
    %c0_i32 = arith.constant 0 : i32
    %c0_i32_0 = arith.constant 0 : i32
    return %arg1, %arg0, %c0_i32 : i32, i32, i32
  }
}

</mosaic_0001>

<bundles_post_ra>
// kernel: l_color.1
= control target key start
LH: loop header
LB: loop body
LE: loop exit
PB: predicated region body
PF: predicated region fallthrough
CT: control target
= control target key end

     0   :  { %v78_v0 = vmov 0.0   ;;  %vm61_vm0 = vcmask 1045504   ;;  %vm65_vm1 = vcmask 5120   ;;  %s98_s0 = inlined_call_operand.vmem [shape: f32[6,256], index: 0, kind: input, shape index: {}]   ;;  %s99_s1 = inlined_call_operand.vmem [shape: f32[1,6,1], index: 1, kind: output, shape index: {}]  }
   0x1   :  { %44 = vst [vmem:[#allocation2] sm:$0x3f] %v78_v0  ;;  %v51_v1 = vld [vmem:[%s98_s0] sm:$0x3f]  ;;  %v52_v2 = vld [vmem:[%s98_s0 + $0x8] sm:$0x3f] }
   0x2   :  { %v53_v3 = vadd.f32 %v52_v2, %v51_v1 }
   0x8   :  { %v50_v4 = vld [vmem:[#allocation2] sm:$0x3f] }
   0x9   :  { %v55_v5 = vadd.f32 %v53_v3, %v50_v4 }
   0xb   :  { %56 = vst [vmem:[#allocation2] sm:$0x3f] %v55_v5 }
  0x12   :  { %v60_v6 = vld [vmem:[#allocation2] sm:$0x3f] }
  0x13   :  { %v62_v7 = vsel %vm61_vm0, %v60_v6, 0.0 }
  0x14   :  { %63 = vadd.xlane.f32.xlu0 %v62_v7 }
  0xa1   :  { %v64_v8 = vpop.xlane.xlu0 %63 }
  0xa2   :  { %66 = vst.msk [vmem:[%s99_s1] sm:$0x3f] %vm65_vm1, %v64_v8 }

</bundles_post_ra>
